<compile_context>
chip_gen: v6e
topology: v6e:2x2x1
jax: 0.10.0
libtpu: 0.0.40
codegen_flags: <defaults>
</compile_context>

<pallas_src>
import functools

import jax
import jax.numpy as jnp
from jax.experimental import pallas as pl
from jax.experimental.pallas import tpu as pltpu


def _round_up(x, m):
    return (x + m - 1) // m * m


def cnn_kernel(x_ref, w_ref, b_ref, o_ref, *, e_char):
    """Fused conv1d + bias + ReLU + max-pool for one batch tile.

    x_ref: (m_word*e_char, bt)  activations, flattened (word_pos, char) rows,
                                 batch in lanes (f32)
    w_ref: (F, e_char*K)         filters flattened k-major / c-minor (f32)
    b_ref: (F, 1)                bias (f32)
    o_ref: (F, bt)               pooled output (f32), fully lane-dense
    """
    LC, bt = x_ref.shape
    F_, CK = w_ref.shape
    L_out = (LC - CK) // e_char + 1          # = m_word - kernel_size + 1

    w = w_ref[...]                            # (F, CK), stays resident

    def conv_at(l):
        # Rows [l*e_char, l*e_char + CK) are exactly the (char, tap) window for
        # output position l; the slice start is a static multiple of 8 sublanes.
        xl = x_ref[l * e_char:l * e_char + CK, :]          # (CK, bt)
        return jnp.dot(w, xl, preferred_element_type=jnp.float32)   # (F, bt)

    # Running max over the L_out conv positions (fused max-pool): the carry is
    # only (F, bt) f32, so nothing large ever spills to VMEM.
    best = conv_at(0)
    for l in range(1, L_out):                 # static unroll (L_out = 17)
        best = jnp.maximum(best, conv_at(l))

    # bias-add and ReLU commute with the max (both monotone, bias const in l).
    o_ref[...] = jnp.maximum(best + b_ref[...], 0.0)


def cnn_forward(x, w, b, *, b_tile=128):
    """x: (B, e_char, m_word) NCW (as PyTorch), w: (F, e_char, K), b: (F,).

    Returns (B, F) float32 = maxpool(relu(conv1d(x))).squeeze(-1).
    """
    B, C, Lw = x.shape
    F_, C2, K = w.shape
    assert C2 == C
    L_out = Lw - K + 1
    CK = C * K

    # Batch tile: multiple of 128 (lane dim), at most the padded batch.
    bt = _round_up(min(b_tile, _round_up(B, 128)), 128)
    B_pad = _round_up(B, bt)

    # --- wrapper-side layout plumbing (tiny, one XLA pass over x) ------------
    # (B, C, Lw) -> (Lw, C, B) -> flatten to (Lw*C, B): row lw*C + c holds
    # x[:, c, lw] across the batch.  168 rows x B_pad lanes => zero tile padding.
    xt = jnp.transpose(x, (2, 1, 0)).astype(jnp.float32).reshape(Lw * C, B)
    if B_pad != B:
        xt = jnp.pad(xt, ((0, 0), (0, B_pad - B)))

    # filters (F, C, K) -> (F, K*C), k-major / c-minor to match the x row order.
    w2 = jnp.transpose(w, (0, 2, 1)).reshape(F_, CK).astype(jnp.float32)
    b2 = b.reshape(F_, 1).astype(jnp.float32)

    cost = pl.CostEstimate(
        flops=2 * B_pad * L_out * F_ * CK,
        transcendentals=0,
        bytes_accessed=int(xt.size + w2.size + b2.size + F_ * B_pad) * 4,
    )

    out_fb = pl.pallas_call(
        functools.partial(cnn_kernel, e_char=C),
        out_shape=jax.ShapeDtypeStruct((F_, B_pad), jnp.float32),
        grid=(B_pad // bt,),
        in_specs=[
            pl.BlockSpec((Lw * C, bt), lambda i: (0, i)),   # per-tile activations
            pl.BlockSpec((F_, CK), lambda i: (0, 0)),       # shared filters
            pl.BlockSpec((F_, 1), lambda i: (0, 0)),        # shared bias
        ],
        out_specs=pl.BlockSpec((F_, bt), lambda i: (0, i)),
        compiler_params=pltpu.CompilerParams(
            dimension_semantics=("parallel",)),
        cost_estimate=cost,
    )(xt, w2, b2)

    # (F, B_pad) -> (B, F); a ~32 KiB slice+transpose, negligible.
    return out_fb[:, :B].T


def cnn_reference(x, w, b):
    """Plain-JAX f32 reference matching PyTorch Conv1d + ReLU + MaxPool1d."""
    B, C, Lw = x.shape
    F_, _, K = w.shape
    L_out = Lw - K + 1
    conv = jnp.zeros((B, F_, L_out), jnp.float32)
    for k in range(K):
        conv = conv + jnp.einsum(
            "bcl,fc->bfl",
            x[:, :, k:k + L_out].astype(jnp.float32),
            w[:, :, k].astype(jnp.float32))
    conv = conv + b.reshape(1, F_, 1)
    conv = jnp.maximum(conv, 0.0)
    return jnp.max(conv, axis=-1)


if __name__ == "__main__":
    # Module-consistent sizes: e_char=8, m_word=21, kernel_size=5, filter_size=16.
    # B is the flattened word batch (sentences x words); B=512 with bt=128 gives
    # a 4-step "parallel" grid (both v7x cores busy, pipelined on v6e/v5e).
    B, e_char, m_word = 512, 8, 21
    kernel_size, filter_size = 5, 16

    key = jax.random.PRNGKey(0)
    kx, kw, kb = jax.random.split(key, 3)
    x = jax.random.normal(kx, (B, e_char, m_word), dtype=jnp.float32)
    w = jax.random.normal(kw, (filter_size, e_char, kernel_size), dtype=jnp.float32) * 0.1
    b = jax.random.normal(kb, (filter_size,), dtype=jnp.float32) * 0.1

    out = jax.block_until_ready(cnn_forward(x, w, b))
    ref = jax.block_until_ready(cnn_reference(x, w, b))

    assert out.shape == (B, filter_size), out.shape
    # f32 operands; tolerance covers any internal bf16-pass MXU accumulation.
    assert jnp.allclose(out, ref, atol=2e-2, rtol=2e-2), \
        float(jnp.max(jnp.abs(out - ref)))
    print("KERNEL_OK")
</pallas_src>

<mosaic_0001>
module attributes {stable_mosaic.version = 11 : i64} {
  func.func @cnn_kernel(%arg0: i32, %arg1: memref<168x128xf32, #tpu.memory_space<vmem>>, %arg2: memref<16x40xf32, #tpu.memory_space<vmem>>, %arg3: memref<16x1xf32, #tpu.memory_space<vmem>>, %arg4: memref<16x128xf32, #tpu.memory_space<vmem>>) attributes {dimension_semantics = [#tpu.dimension_semantics<parallel>], iteration_bounds = array<i64: 4>, scalar_prefetch = 0 : i64, scratch_operands = 0 : i64, tpu.core_type = #tpu.core_type<tc>, window_params = [{transform_indices = @transform_0, window_bounds = array<i64: 168, 128>}, {pipeline_mode = #tpu.pipeline_mode<synchronous>, transform_indices = @transform_1, window_bounds = array<i64: 16, 40>}, {pipeline_mode = #tpu.pipeline_mode<synchronous>, transform_indices = @transform_2, window_bounds = array<i64: 16, 1>}, {transform_indices = @transform_3, window_bounds = array<i64: 16, 128>}]} {
    %c0 = arith.constant 0 : index
    %c0_0 = arith.constant 0 : index
    %0 = vector.load %arg2[%c0, %c0_0] : memref<16x40xf32, #tpu.memory_space<vmem>>, vector<16x40xf32>
    %c0_1 = arith.constant 0 : index
    %c0_2 = arith.constant 0 : index
    %1 = vector.load %arg1[%c0_1, %c0_2] : memref<168x128xf32, #tpu.memory_space<vmem>>, vector<40x128xf32>
    %cst = arith.constant dense<0.000000e+00> : vector<16x128xf32>
    %2 = tpu.matmul %0, %1, %cst {dimension_numbers = #tpu.dot_dimension_numbers<[1], [0], [0], [1], [0, 0, 1, 1], [], []>} : vector<16x40xf32>, vector<40x128xf32>, vector<16x128xf32> -> vector<16x128xf32>
    %c8 = arith.constant 8 : index
    %c0_3 = arith.constant 0 : index
    %3 = vector.load %arg1[%c8, %c0_3] : memref<168x128xf32, #tpu.memory_space<vmem>>, vector<40x128xf32>
    %cst_4 = arith.constant dense<0.000000e+00> : vector<16x128xf32>
    %4 = tpu.matmul %0, %3, %cst_4 {dimension_numbers = #tpu.dot_dimension_numbers<[1], [0], [0], [1], [0, 0, 1, 1], [], []>} : vector<16x40xf32>, vector<40x128xf32>, vector<16x128xf32> -> vector<16x128xf32>
    %5 = arith.maximumf %2, %4 : vector<16x128xf32>
    %c16 = arith.constant 16 : index
    %c0_5 = arith.constant 0 : index
    %6 = vector.load %arg1[%c16, %c0_5] : memref<168x128xf32, #tpu.memory_space<vmem>>, vector<40x128xf32>
    %cst_6 = arith.constant dense<0.000000e+00> : vector<16x128xf32>
    %7 = tpu.matmul %0, %6, %cst_6 {dimension_numbers = #tpu.dot_dimension_numbers<[1], [0], [0], [1], [0, 0, 1, 1], [], []>} : vector<16x40xf32>, vector<40x128xf32>, vector<16x128xf32> -> vector<16x128xf32>
    %8 = arith.maximumf %5, %7 : vector<16x128xf32>
    %c24 = arith.constant 24 : index
    %c0_7 = arith.constant 0 : index
    %9 = vector.load %arg1[%c24, %c0_7] : memref<168x128xf32, #tpu.memory_space<vmem>>, vector<40x128xf32>
    %cst_8 = arith.constant dense<0.000000e+00> : vector<16x128xf32>
    %10 = tpu.matmul %0, %9, %cst_8 {dimension_numbers = #tpu.dot_dimension_numbers<[1], [0], [0], [1], [0, 0, 1, 1], [], []>} : vector<16x40xf32>, vector<40x128xf32>, vector<16x128xf32> -> vector<16x128xf32>
    %11 = arith.maximumf %8, %10 : vector<16x128xf32>
    %c32 = arith.constant 32 : index
    %c0_9 = arith.constant 0 : index
    %12 = vector.load %arg1[%c32, %c0_9] : memref<168x128xf32, #tpu.memory_space<vmem>>, vector<40x128xf32>
    %cst_10 = arith.constant dense<0.000000e+00> : vector<16x128xf32>
    %13 = tpu.matmul %0, %12, %cst_10 {dimension_numbers = #tpu.dot_dimension_numbers<[1], [0], [0], [1], [0, 0, 1, 1], [], []>} : vector<16x40xf32>, vector<40x128xf32>, vector<16x128xf32> -> vector<16x128xf32>
    %14 = arith.maximumf %11, %13 : vector<16x128xf32>
    %c40 = arith.constant 40 : index
    %c0_11 = arith.constant 0 : index
    %15 = vector.load %arg1[%c40, %c0_11] : memref<168x128xf32, #tpu.memory_space<vmem>>, vector<40x128xf32>
    %cst_12 = arith.constant dense<0.000000e+00> : vector<16x128xf32>
    %16 = tpu.matmul %0, %15, %cst_12 {dimension_numbers = #tpu.dot_dimension_numbers<[1], [0], [0], [1], [0, 0, 1, 1], [], []>} : vector<16x40xf32>, vector<40x128xf32>, vector<16x128xf32> -> vector<16x128xf32>
    %17 = arith.maximumf %14, %16 : vector<16x128xf32>
    %c48 = arith.constant 48 : index
    %c0_13 = arith.constant 0 : index
    %18 = vector.load %arg1[%c48, %c0_13] : memref<168x128xf32, #tpu.memory_space<vmem>>, vector<40x128xf32>
    %cst_14 = arith.constant dense<0.000000e+00> : vector<16x128xf32>
    %19 = tpu.matmul %0, %18, %cst_14 {dimension_numbers = #tpu.dot_dimension_numbers<[1], [0], [0], [1], [0, 0, 1, 1], [], []>} : vector<16x40xf32>, vector<40x128xf32>, vector<16x128xf32> -> vector<16x128xf32>
    %20 = arith.maximumf %17, %19 : vector<16x128xf32>
    %c56 = arith.constant 56 : index
    %c0_15 = arith.constant 0 : index
    %21 = vector.load %arg1[%c56, %c0_15] : memref<168x128xf32, #tpu.memory_space<vmem>>, vector<40x128xf32>
    %cst_16 = arith.constant dense<0.000000e+00> : vector<16x128xf32>
    %22 = tpu.matmul %0, %21, %cst_16 {dimension_numbers = #tpu.dot_dimension_numbers<[1], [0], [0], [1], [0, 0, 1, 1], [], []>} : vector<16x40xf32>, vector<40x128xf32>, vector<16x128xf32> -> vector<16x128xf32>
    %23 = arith.maximumf %20, %22 : vector<16x128xf32>
    %c64 = arith.constant 64 : index
    %c0_17 = arith.constant 0 : index
    %24 = vector.load %arg1[%c64, %c0_17] : memref<168x128xf32, #tpu.memory_space<vmem>>, vector<40x128xf32>
    %cst_18 = arith.constant dense<0.000000e+00> : vector<16x128xf32>
    %25 = tpu.matmul %0, %24, %cst_18 {dimension_numbers = #tpu.dot_dimension_numbers<[1], [0], [0], [1], [0, 0, 1, 1], [], []>} : vector<16x40xf32>, vector<40x128xf32>, vector<16x128xf32> -> vector<16x128xf32>
    %26 = arith.maximumf %23, %25 : vector<16x128xf32>
    %c72 = arith.constant 72 : index
    %c0_19 = arith.constant 0 : index
    %27 = vector.load %arg1[%c72, %c0_19] : memref<168x128xf32, #tpu.memory_space<vmem>>, vector<40x128xf32>
    %cst_20 = arith.constant dense<0.000000e+00> : vector<16x128xf32>
    %28 = tpu.matmul %0, %27, %cst_20 {dimension_numbers = #tpu.dot_dimension_numbers<[1], [0], [0], [1], [0, 0, 1, 1], [], []>} : vector<16x40xf32>, vector<40x128xf32>, vector<16x128xf32> -> vector<16x128xf32>
    %29 = arith.maximumf %26, %28 : vector<16x128xf32>
    %c80 = arith.constant 80 : index
    %c0_21 = arith.constant 0 : index
    %30 = vector.load %arg1[%c80, %c0_21] : memref<168x128xf32, #tpu.memory_space<vmem>>, vector<40x128xf32>
    %cst_22 = arith.constant dense<0.000000e+00> : vector<16x128xf32>
    %31 = tpu.matmul %0, %30, %cst_22 {dimension_numbers = #tpu.dot_dimension_numbers<[1], [0], [0], [1], [0, 0, 1, 1], [], []>} : vector<16x40xf32>, vector<40x128xf32>, vector<16x128xf32> -> vector<16x128xf32>
    %32 = arith.maximumf %29, %31 : vector<16x128xf32>
    %c88 = arith.constant 88 : index
    %c0_23 = arith.constant 0 : index
    %33 = vector.load %arg1[%c88, %c0_23] : memref<168x128xf32, #tpu.memory_space<vmem>>, vector<40x128xf32>
    %cst_24 = arith.constant dense<0.000000e+00> : vector<16x128xf32>
    %34 = tpu.matmul %0, %33, %cst_24 {dimension_numbers = #tpu.dot_dimension_numbers<[1], [0], [0], [1], [0, 0, 1, 1], [], []>} : vector<16x40xf32>, vector<40x128xf32>, vector<16x128xf32> -> vector<16x128xf32>
    %35 = arith.maximumf %32, %34 : vector<16x128xf32>
    %c96 = arith.constant 96 : index
    %c0_25 = arith.constant 0 : index
    %36 = vector.load %arg1[%c96, %c0_25] : memref<168x128xf32, #tpu.memory_space<vmem>>, vector<40x128xf32>
    %cst_26 = arith.constant dense<0.000000e+00> : vector<16x128xf32>
    %37 = tpu.matmul %0, %36, %cst_26 {dimension_numbers = #tpu.dot_dimension_numbers<[1], [0], [0], [1], [0, 0, 1, 1], [], []>} : vector<16x40xf32>, vector<40x128xf32>, vector<16x128xf32> -> vector<16x128xf32>
    %38 = arith.maximumf %35, %37 : vector<16x128xf32>
    %c104 = arith.constant 104 : index
    %c0_27 = arith.constant 0 : index
    %39 = vector.load %arg1[%c104, %c0_27] : memref<168x128xf32, #tpu.memory_space<vmem>>, vector<40x128xf32>
    %cst_28 = arith.constant dense<0.000000e+00> : vector<16x128xf32>
    %40 = tpu.matmul %0, %39, %cst_28 {dimension_numbers = #tpu.dot_dimension_numbers<[1], [0], [0], [1], [0, 0, 1, 1], [], []>} : vector<16x40xf32>, vector<40x128xf32>, vector<16x128xf32> -> vector<16x128xf32>
    %41 = arith.maximumf %38, %40 : vector<16x128xf32>
    %c112 = arith.constant 112 : index
    %c0_29 = arith.constant 0 : index
    %42 = vector.load %arg1[%c112, %c0_29] : memref<168x128xf32, #tpu.memory_space<vmem>>, vector<40x128xf32>
    %cst_30 = arith.constant dense<0.000000e+00> : vector<16x128xf32>
    %43 = tpu.matmul %0, %42, %cst_30 {dimension_numbers = #tpu.dot_dimension_numbers<[1], [0], [0], [1], [0, 0, 1, 1], [], []>} : vector<16x40xf32>, vector<40x128xf32>, vector<16x128xf32> -> vector<16x128xf32>
    %44 = arith.maximumf %41, %43 : vector<16x128xf32>
    %c120 = arith.constant 120 : index
    %c0_31 = arith.constant 0 : index
    %45 = vector.load %arg1[%c120, %c0_31] : memref<168x128xf32, #tpu.memory_space<vmem>>, vector<40x128xf32>
    %cst_32 = arith.constant dense<0.000000e+00> : vector<16x128xf32>
    %46 = tpu.matmul %0, %45, %cst_32 {dimension_numbers = #tpu.dot_dimension_numbers<[1], [0], [0], [1], [0, 0, 1, 1], [], []>} : vector<16x40xf32>, vector<40x128xf32>, vector<16x128xf32> -> vector<16x128xf32>
    %47 = arith.maximumf %44, %46 : vector<16x128xf32>
    %c128 = arith.constant 128 : index
    %c0_33 = arith.constant 0 : index
    %48 = vector.load %arg1[%c128, %c0_33] : memref<168x128xf32, #tpu.memory_space<vmem>>, vector<40x128xf32>
    %cst_34 = arith.constant dense<0.000000e+00> : vector<16x128xf32>
    %49 = tpu.matmul %0, %48, %cst_34 {dimension_numbers = #tpu.dot_dimension_numbers<[1], [0], [0], [1], [0, 0, 1, 1], [], []>} : vector<16x40xf32>, vector<40x128xf32>, vector<16x128xf32> -> vector<16x128xf32>
    %50 = arith.maximumf %47, %49 : vector<16x128xf32>
    %c0_35 = arith.constant 0 : index
    %c0_36 = arith.constant 0 : index
    %51 = vector.load %arg3[%c0_35, %c0_36] : memref<16x1xf32, #tpu.memory_space<vmem>>, vector<16x1xf32>
    %52 = vector.broadcast %51 : vector<16x1xf32> to vector<16x128xf32>
    %53 = arith.addf %50, %52 : vector<16x128xf32>
    %cst_37 = arith.constant 0.000000e+00 : f32
    %54 = vector.broadcast %cst_37 : f32 to vector<16x128xf32>
    %55 = arith.maximumf %53, %54 : vector<16x128xf32>
    %c0_38 = arith.constant 0 : index
    %c0_39 = arith.constant 0 : index
    %56 = vector.load %arg4[%c0_38, %c0_39] : memref<16x128xf32, #tpu.memory_space<vmem>>, vector<16x128xf32>
    tpu.vector_store %arg4[%c0_38, %c0_39], %55 {strides = array<i32>} : memref<16x128xf32, #tpu.memory_space<vmem>>, vector<16x128xf32>,
    return
  }
  func.func @transform_0(%arg0: i32) -> (i32, i32) {
    %c0_i32 = arith.constant 0 : i32
    %c0_i32_0 = arith.constant 0 : i32
    return %c0_i32, %arg0 : i32, i32
  }
  func.func @transform_1(%arg0: i32) -> (i32, i32) {
    %c0_i32 = arith.constant 0 : i32
    %c0_i32_0 = arith.constant 0 : i32
    %c0_i32_1 = arith.constant 0 : i32
    return %c0_i32, %c0_i32_0 : i32, i32
  }
  func.func @transform_2(%arg0: i32) -> (i32, i32) {
    %c0_i32 = arith.constant 0 : i32
    %c0_i32_0 = arith.constant 0 : i32
    %c0_i32_1 = arith.constant 0 : i32
    return %c0_i32, %c0_i32_0 : i32, i32
  }
  func.func @transform_3(%arg0: i32) -> (i32, i32) {
    %c0_i32 = arith.constant 0 : i32
    %c0_i32_0 = arith.constant 0 : i32
    return %c0_i32, %arg0 : i32, i32
  }
}

</mosaic_0001>

<bundles_post_ra>
// kernel: tpu_custom_call.1
= control target key start
LH: loop header
LB: loop body
LE: loop exit
PB: predicated region body
PF: predicated region fallthrough
CT: control target
= control target key end

     0   :  { %8 = vsyncpa [#allocation3], 0  ;;  %s2678_s0 = inlined_call_operand.hbm [shape: f32[168,512], index: 0, kind: input, shape index: {}]   ;;  %s2679_s1 = inlined_call_operand.vmem [shape: f32[16,40], index: 1, kind: input, shape index: {}]   ;;  %s2680_s2 = inlined_call_operand.vmem [shape: f32[16,1], index: 2, kind: input, shape index: {}]   ;;  %s2681_s3 = inlined_call_operand.hbm [shape: f32[16,512], index: 3, kind: output, shape index: {}]  }
   0x1   :  { %10 = vsyncpa [#allocation3 + $0x1], 0 }
   0x2   :  { %11 = vsyncpa [#allocation4], 0 }
   0x3   :  { %13 = vsyncpa [#allocation4 + $0x1], 0  ;;  %s2256_s12 = smov 0   ;;  %s2258_s13 = smov 0  }
   0x4   :  { %s2260_s14 = smov 0   ;;  %s2262_s15 = smov 0  }
   0x5 LB: > { %s2277_s16 = sadd.s32 4294967295, %s2225_s15   ;;  %s1693_s17 = sadd.s32 4294967294, %s2225_s15   ;;  %s2225_s15 = sphi %s2262_s15, %s2695_s15   ;;  %s2221_s14 = sphi %s2260_s14, %s2694_s14   ;;  %s2217_s13 = sphi %s2258_s13, %s2693_s13   ;;  %s2213_s12 = sphi %s2256_s12, %s2692_s12  }
   0x6   : > { %s2281_s18 = sadd.s32 1, %s2225_s15   ;;  %s26_s19 = sadd.s32 1, %s2221_s14 }
   0x7   : > { %s23_s20 = ssub.s32 %s2225_s15, %s2281_s18  ;;  %p33_p0 = scmp.ne.s32.totalorder %s2221_s14, %s2217_s13 }
   0x8   : > { %p24_p1 = scmp.eq.s32.totalorder %s23_s20, 0  ;;  %p34_p2 = scmp.eq.s32.totalorder %s2225_s15, 0 }
   0x9   : > { %p39_p3 = scmp.ne.s32.totalorder %s2217_s13, %s2213_s12  ;;  %p40_p4 = scmp.eq.s32.totalorder %s2277_s16, 0 }
   0xa   : > { %s2293_s21 = scalar_select %p24_p1, %s2221_s14, %s26_s19  }
   0xb   : > { %p35_p5 = por %p34_p2, %p33_p0  ;;  %p2295_p6 = por %p40_p4, %p39_p3 }
   0xc   : > { %p105_p7 = scmp.eq.s32.totalorder %s2277_s16, 3  ;;  %p111_p8 = scmp.eq.s32.totalorder %s1693_s17, 3 }
   0xd   : > { %s2684_s22 = scalar_select %p2295_p6, 1, 0 }
   0xe   : > { %p2091_p9 = scmp.lt.s32.totalorder %s2225_s15, 4  ;;  %p2301_p10 = por %p105_p7, %p33_p0 }
   0xf   : > { %p2305_p11 = por %p111_p8, %p39_p3  ;;  %s137_s25 = sand.u32 1, %s2221_s14  }
  0x10   : > { %s2685_s23 = scalar_select %p2301_p10, 1, 0 }
  0x11   : > { %s2686_s24 = scalar_select %p2305_p11, 1, 0 }
  0x12   : > { %s1696_s26 = sshll.u32 %s2225_s15, 7  ;;  %s2077_s27 = smul.u32 168, %s137_s25 }
  0x13   : > { %s2314_s30 = scalar_lea.hbm %s2678_s0, %s1696_s26  ;;  %p2316_p12 = pnand %p2091_p9, %p35_p5 }
  0x14   : > { %s141_s5 = scalar_lea.vmem [#allocation2], %s2077_s27  ;;  %s2323_s7 = scalar_lea.sflag [#allocation3], %s137_s25 }
  0x15   : > { %s147_s6 = sshll.u32 %s141_s5, 4  ;;  %s2133_s8 = scalar_lea.hbm %s2314_s30, 2688  ;;  %s2320_s6 = int_to_ptr.vmem [resolvable:$true] %s147_s6 }
  0x16   : > { %p2134_p0 = scmp.ne.s32.totalorder %s2314_s30, %s2133_s8  ;;  %p2135_p1 = pneg %p2316_p12 }
  0x17   : > { %s2138_s11 = scalar_lea.hbm %s2678_s0, 10752  ;;  %p2139_p4 = scmp.lt.s32.totalorder %s2314_s30, %s2678_s0 }
  0x18   : > { %p2136_p2 = pnand %p2135_p1, %p2134_p0  ;;  %p2140_p5 = scmp.lt.s32.totalorder %s2138_s11, %s2133_s8 }
  0x1a   : > { %p2137_p3 = pneg %p2136_p2  ;;  %p2141_p7 = por %p2140_p5, %p2139_p4 }
  0x1c   : > { %p2142_p8 = pnand %p2141_p7, %p2137_p3 }
  0x1e   : > { %2145 = shalt.err (!%p2142_p8)
}
  0x1f   : > { %s2146_s20 = scalar_lea.vmem %s2320_s6, 2688  ;;  %s2227_s25 = smov [#allocation2]  }
  0x20   : > { %p2147_p9 = scmp.ne.s32.totalorder %s2320_s6, %s2146_s20  ;;  %s2151_s26 = sshll.u32 %s2227_s25, 4  ;;  %s2152_s26 = int_to_ptr.vmem [resolvable:$false] %s2151_s26 }
  0x21   : > { %s2153_s27 = scalar_lea.vmem %s2152_s26, 5376  ;;  %p2154_p2 = scmp.lt.s32.totalorder %s2320_s6, %s2152_s26 }
  0x22   : > { %p2149_p13 = pnand %p2147_p9, %p2135_p1  ;;  %p2155_p11 = scmp.lt.s32.totalorder %s2153_s27, %s2146_s20 }
  0x24   : > { %p2150_p0 = pneg %p2149_p13  ;;  %p2156_p10 = por %p2155_p11, %p2154_p2 }
  0x26   : > { %p2157_p6 = pnand %p2156_p10, %p2150_p0 }
  0x28   : > { %2160 = shalt.err (!%p2157_p6)
}
  0x29   : > { %s2228_s28 = smov 512   ;;  %s2229_s29 = smov 128  }
  0x2a   : > { %s2230_s5 = smov 8   ;;  %p155_p13 = scmp.lt.s32.totalorder %s2225_s15, 5 }
  0x2b   : > { %2086 = dma.hbm_to_vmem [thread:$0]  (!%p2316_p12), %s2314_s30, 2688, %s2320_s6, %s2323_s7, %s2228_s28, %s2229_s29, %s2230_s5  }
  0x2c   : > { %p2688_p1 = scmp.ge.s32.totalorder %s2225_s15, 1 }
  0x2e   : > { %p156_p3 = pnand %p2688_p1, %p155_p13 }
  0x2f   : > { %s2348_s8 = sand.u32 (!%p156_p3), 1, %s2217_s13   ;;  %p2689_p6 = scmp.ne.s32.totalorder (!%p156_p3), %s2684_s22, 0 }
  0x30   : > { %159 = sbr.rel (%p156_p3) target bundleno = 376 (0x178), region = 32  ;;  %s162_s10 = scalar_lea.sflag (!%p156_p3), [#allocation3], %s2348_s8 }
  0x31   : > { %s2078_s9 = smul.u32 (!%p156_p3), 168, %s2348_s8 }
  0x33   : > { %s2352_s11 = scalar_lea.vmem (!%p156_p3), [#allocation2], %s2078_s9 }
  0x35   : > { %2204 = dma.done.wait (%p2689_p6), %s162_s10, 2688  }
  0x36   : > { %2206 = vsyncadd (%p2689_p6), %s162_s10, 4294964608  ;;  %v2231_v0 = vmov 0   ;;  %v2359_v1 = vld [vmem:[%s2352_s11 + $0x20] sm:$0xff]  ;;  %v2362_v2 = vld [vmem:[%s2352_s11 + $0x28] sm:$0xff]  ;;  %vm195_vm0 = vcmask 326656   ;;  %s1698_s25 = sshll.u32 %s2348_s8, 4 }
  0x37   : > { %2132 = vset.pattern.permute.xlu0 %v2231_v0  ;;  %v193_v3 = vld [vmem:[%s2352_s11 + $0x18] sm:$0xff]  ;;  %1856 = vmatprep.subr.mxu0 %v2359_v1  ;;  %v192_v4 = vld [vmem:[%s2352_s11 + $0x10] sm:$0xff]  ;;  %v191_v5 = vld [vmem:[%s2352_s11 + $0x8] sm:$0xff]  ;;  %s187_s26 = scalar_lea.vmem [#allocation5], %s1698_s25  ;;  %s1734_s28 = sshll.u32 %s2277_s16, 7 }
  0x38   : > { %1869 = vmatprep.subr.mxu1 %v2362_v2  ;;  %1857 = vmatpush3.msra.mxu0 %v2359_v1  ;;  %v190_v6 = vld [vmem:[%s2352_s11] sm:$0xff]  ;;  %v2387_v9 = vld [vmem:[%s2352_s11 + $0x30] sm:$0xff]  ;;  %v2390_v10 = vld [vmem:[%s2352_s11 + $0x38] sm:$0xff]  ;;  %s1620_s27 = sshll.u32 %s187_s26, 4  ;;  %s2636_s9 = scalar_lea.hbm %s2681_s3, %s1734_s28  ;;  %s2631_s27 = int_to_ptr.vmem [resolvable:$true] %s1620_s27 }
  0x39   : > { %1870 = vmatpush3.msra.mxu1 %v2362_v2  ;;  %1858 = vmatprep.subr.mxu0 %v193_v3  ;;  %v2377_v7 = vld [vmem:[%s2679_s1] sm:$0xff]  ;;  %v2382_v8 = vld [vmem:[%s2679_s1 + $0x8] sm:$0xff]  ;;  %v2443_v13 = vld [vmem:[%s2352_s11 + $0x50] sm:$0xff]  ;;  %s1608_s10 = scalar_lea.sflag [#allocation4], %s2348_s8  ;;  %p2690_p11 = scmp.ne.s32.totalorder %s2685_s23, 0 }
  0x3a   : > { %1871 = vmatprep.subr.mxu1 %v2359_v1  ;;  %1859 = vmatpush3.msra.mxu0 %v193_v3  ;;  %v2414_v11 = vld [vmem:[%s2352_s11 + $0x40] sm:$0xff]  ;;  %v2421_v12 = vld [vmem:[%s2352_s11 + $0x48] sm:$0xff]  ;;  %v2454_v14 = vld [vmem:[%s2352_s11 + $0x58] sm:$0xff]  ;;  %s2232_s16 = smov [#allocation5]  }
  0x3b   : > { %1872 = vmatpush3.msra.mxu1 %v2359_v1  ;;  %1860 = vmatprep.subr.mxu0 %v192_v4  ;;  %v2477_v15 = vld [vmem:[%s2352_s11 + $0x60] sm:$0xff]  ;;  %v2488_v16 = vld [vmem:[%s2352_s11 + $0x68] sm:$0xff]  ;;  %v2511_v17 = vld [vmem:[%s2352_s11 + $0x70] sm:$0xff]  ;;  %s2165_s22 = sshll.u32 %s2232_s16, 4  ;;  %s2166_s22 = int_to_ptr.vmem [resolvable:$false] %s2165_s22 }
  0x3c   : > { %1873 = vmatprep.subr.mxu1 %v193_v3  ;;  %1861 = vmatpush3.msra.mxu0 %v192_v4  ;;  %v2522_v18 = vld [vmem:[%s2352_s11 + $0x78] sm:$0xff]  ;;  %v2545_v19 = vld [vmem:[%s2352_s11 + $0x80] sm:$0xff]  ;;  %v2556_v20 = vld [vmem:[%s2352_s11 + $0x88] sm:$0xff]  ;;  %s2167_s30 = scalar_lea.vmem %s2166_s22, 512  ;;  %p2168_p5 = scmp.lt.s32.totalorder %s2631_s27, %s2166_s22 }
  0x3d   : > { %1874 = vmatpush3.msra.mxu1 %v193_v3  ;;  %1862 = vmatprep.subr.mxu0 %v191_v5  ;;  %v1347_v21 = vld [vmem:[%s2352_s11 + $0x90] sm:$0xff]  ;;  %v1429_v22 = vld [vmem:[%s2352_s11 + $0x98] sm:$0xff]  ;;  %v1511_v23 = vld [vmem:[%s2352_s11 + $0xa0] sm:$0xff]  ;;  %s2161_s11 = scalar_lea.vmem %s2631_s27, 256 }
  0x3e   : > { %1875 = vmatprep.subr.mxu1 %v192_v4  ;;  %1863 = vmatpush3.msra.mxu0 %v191_v5  ;;  %v1589_v24 = vld [vmem:[%s2680_s2] sm:$0xff]  ;;  %v1590_v25 = vld [vmem:[%s2680_s2 + $0x8] sm:$0xff]  ;;  %p2162_p10 = scmp.ne.s32.totalorder %s2631_s27, %s2161_s11  ;;  %p2169_p7 = scmp.lt.s32.totalorder %s2167_s30, %s2161_s11 }
  0x3f   : > { %1876 = vmatpush3.msra.mxu1 %v192_v4  ;;  %1864 = vmatprep.subr.mxu0 %v190_v6 }
  0x40   : > { %1877 = vmatprep.subr.mxu1 %v191_v5  ;;  %1865 = vmatpush3.msra.mxu0 %v190_v6  ;;  %p2163_p12 = pnand %p2162_p10, %p2690_p11  ;;  %p2170_p8 = por %p2169_p7, %p2168_p5 }
  0x41   : > { %1866 = vmatprep.mubr.msk.f32.mxu0 %vm195_vm0, %v2377_v7  ;;  %1878 = vmatpush3.msra.mxu1 %v191_v5 }
  0x42   : > { %1879 = vmatprep.mubr.msk.f32.mxu1 %vm195_vm0, %v2377_v7  ;;  %1867 = vmatmul.mubr.msk.f32.vlgmr.msra.gmra.mxu0 %vm195_vm0, %v2382_v8  ;;  %p2164_p4 = pneg %p2163_p12 }
  0x43   : > { %1880 = vmatmul.mubr.msk.f32.vlgmr.msra.gmra.mxu1 %vm195_vm0, %v2382_v8  ;;  %1882 = vmatprep.subr.mxu0 %v2387_v9 }
  0x44   : > { %1895 = vmatprep.subr.mxu1 %v2390_v10  ;;  %1883 = vmatpush3.msra.mxu0 %v2387_v9  ;;  %p2171_p9 = pnand %p2170_p8, %p2164_p4 }
  0x45   : > { %1896 = vmatpush3.msra.mxu1 %v2390_v10  ;;  %1884 = vmatprep.subr.mxu0 %v2362_v2 }
  0x46   : > { %1897 = vmatprep.subr.mxu1 %v2387_v9  ;;  %1885 = vmatpush3.msra.mxu0 %v2362_v2 }
  0x47   : > { %1898 = vmatpush3.msra.mxu1 %v2387_v9  ;;  %1886 = vmatprep.subr.mxu0 %v2359_v1 }
  0x48   : > { %1899 = vmatprep.subr.mxu1 %v2362_v2  ;;  %1887 = vmatpush3.msra.mxu0 %v2359_v1 }
  0x49   : > { %1900 = vmatpush3.msra.mxu1 %v2362_v2  ;;  %1888 = vmatprep.subr.mxu0 %v193_v3 }
  0x4a   : > { %1901 = vmatprep.subr.mxu1 %v2359_v1  ;;  %1889 = vmatpush3.msra.mxu0 %v193_v3 }
  0x4b   : > { %1892 = vmatprep.mubr.msk.f32.mxu0 %vm195_vm0, %v2377_v7  ;;  %1890 = vmatprep.subr.mxu0 %v192_v4 }
  0x4c   : > { %1902 = vmatpush3.msra.mxu1 %v2359_v1  ;;  %1891 = vmatpush3.msra.mxu0 %v192_v4 }
  0x4d   : > { %1903 = vmatprep.subr.mxu1 %v193_v3  ;;  %1893 = vmatmul.mubr.msk.f32.vlgmr.msra.gmra.mxu0 %vm195_vm0, %v2382_v8 }
  0x4e   : > { %1908 = vmatprep.subr.mxu0 %v2414_v11  ;;  %1904 = vmatpush3.msra.mxu1 %v193_v3 }
  0x4f   : > { %1905 = vmatprep.mubr.msk.f32.mxu1 %vm195_vm0, %v2377_v7  ;;  %1909 = vmatpush3.msra.mxu0 %v2414_v11 }
  0x50   : > { %1906 = vmatmul.mubr.msk.f32.vlgmr.msra.gmra.mxu1 %vm195_vm0, %v2382_v8  ;;  %1910 = vmatprep.subr.mxu0 %v2390_v10 }
  0x51   : > { %1921 = vmatprep.subr.mxu1 %v2421_v12  ;;  %1911 = vmatpush3.msra.mxu0 %v2390_v10 }
  0x52   : > { %1922 = vmatpush3.msra.mxu1 %v2421_v12  ;;  %1912 = vmatprep.subr.mxu0 %v2387_v9 }
  0x53   : > { %1923 = vmatprep.subr.mxu1 %v2414_v11  ;;  %1913 = vmatpush3.msra.mxu0 %v2387_v9 }
  0x54   : > { %1924 = vmatpush3.msra.mxu1 %v2414_v11  ;;  %1914 = vmatprep.subr.mxu0 %v2362_v2 }
  0x55   : > { %1925 = vmatprep.subr.mxu1 %v2390_v10  ;;  %1915 = vmatpush3.msra.mxu0 %v2362_v2 }
  0x56   : > { %1926 = vmatpush3.msra.mxu1 %v2390_v10  ;;  %1916 = vmatprep.subr.mxu0 %v2359_v1 }
  0x57   : > { %1927 = vmatprep.subr.mxu1 %v2387_v9  ;;  %1917 = vmatpush3.msra.mxu0 %v2359_v1 }
  0x58   : > { %1918 = vmatprep.mubr.msk.f32.mxu0 %vm195_vm0, %v2377_v7  ;;  %1928 = vmatpush3.msra.mxu1 %v2387_v9 }
  0x59   : > { %1919 = vmatmul.mubr.msk.f32.vlgmr.msra.gmra.mxu0 %vm195_vm0, %v2382_v8  ;;  %1929 = vmatprep.subr.mxu1 %v2362_v2 }
  0x5a   : > { %1934 = vmatprep.subr.mxu0 %v2443_v13  ;;  %1930 = vmatpush3.msra.mxu1 %v2362_v2 }
  0x5b   : > { %1931 = vmatprep.mubr.msk.f32.mxu1 %vm195_vm0, %v2377_v7  ;;  %1935 = vmatpush3.msra.mxu0 %v2443_v13 }
  0x5c   : > { %1932 = vmatmul.mubr.msk.f32.vlgmr.msra.gmra.mxu1 %vm195_vm0, %v2382_v8  ;;  %1936 = vmatprep.subr.mxu0 %v2421_v12 }
  0x5d   : > { %1947 = vmatprep.subr.mxu1 %v2454_v14  ;;  %1937 = vmatpush3.msra.mxu0 %v2421_v12 }
  0x5e   : > { %1948 = vmatpush3.msra.mxu1 %v2454_v14  ;;  %1938 = vmatprep.subr.mxu0 %v2414_v11 }
  0x5f   : > { %1949 = vmatprep.subr.mxu1 %v2443_v13  ;;  %1939 = vmatpush3.msra.mxu0 %v2414_v11 }
  0x60   : > { %1950 = vmatpush3.msra.mxu1 %v2443_v13  ;;  %1940 = vmatprep.subr.mxu0 %v2390_v10 }
  0x61   : > { %1951 = vmatprep.subr.mxu1 %v2421_v12  ;;  %1941 = vmatpush3.msra.mxu0 %v2390_v10 }
  0x62   : > { %1952 = vmatpush3.msra.mxu1 %v2421_v12  ;;  %1942 = vmatprep.subr.mxu0 %v2387_v9 }
  0x63   : > { %1953 = vmatprep.subr.mxu1 %v2414_v11  ;;  %1943 = vmatpush3.msra.mxu0 %v2387_v9 }
  0x64   : > { %1944 = vmatprep.mubr.msk.f32.mxu0 %vm195_vm0, %v2377_v7  ;;  %1954 = vmatpush3.msra.mxu1 %v2414_v11 }
  0x65   : > { %1945 = vmatmul.mubr.msk.f32.vlgmr.msra.gmra.mxu0 %vm195_vm0, %v2382_v8  ;;  %1955 = vmatprep.subr.mxu1 %v2390_v10 }
  0x66   : > { %1960 = vmatprep.subr.mxu0 %v2477_v15  ;;  %1956 = vmatpush3.msra.mxu1 %v2390_v10 }
  0x67   : > { %1957 = vmatprep.mubr.msk.f32.mxu1 %vm195_vm0, %v2377_v7  ;;  %1961 = vmatpush3.msra.mxu0 %v2477_v15 }
  0x68   : > { %1958 = vmatmul.mubr.msk.f32.vlgmr.msra.gmra.mxu1 %vm195_vm0, %v2382_v8  ;;  %1962 = vmatprep.subr.mxu0 %v2454_v14 }
  0x69   : > { %1973 = vmatprep.subr.mxu1 %v2488_v16  ;;  %1963 = vmatpush3.msra.mxu0 %v2454_v14 }
  0x6a   : > { %1974 = vmatpush3.msra.mxu1 %v2488_v16  ;;  %1964 = vmatprep.subr.mxu0 %v2443_v13 }
  0x6b   : > { %1975 = vmatprep.subr.mxu1 %v2477_v15  ;;  %1965 = vmatpush3.msra.mxu0 %v2443_v13 }
  0x6c   : > { %1976 = vmatpush3.msra.mxu1 %v2477_v15  ;;  %1966 = vmatprep.subr.mxu0 %v2421_v12 }
  0x6d   : > { %1977 = vmatprep.subr.mxu1 %v2454_v14  ;;  %1967 = vmatpush3.msra.mxu0 %v2421_v12 }
  0x6e   : > { %1978 = vmatpush3.msra.mxu1 %v2454_v14  ;;  %1968 = vmatprep.subr.mxu0 %v2414_v11 }
  0x6f   : > { %1979 = vmatprep.subr.mxu1 %v2443_v13  ;;  %1969 = vmatpush3.msra.mxu0 %v2414_v11 }
  0x70   : > { %1970 = vmatprep.mubr.msk.f32.mxu0 %vm195_vm0, %v2377_v7  ;;  %1980 = vmatpush3.msra.mxu1 %v2443_v13 }
  0x71   : > { %1971 = vmatmul.mubr.msk.f32.vlgmr.msra.gmra.mxu0 %vm195_vm0, %v2382_v8  ;;  %1981 = vmatprep.subr.mxu1 %v2421_v12 }
  0x72   : > { %1986 = vmatprep.subr.mxu0 %v2511_v17  ;;  %1982 = vmatpush3.msra.mxu1 %v2421_v12 }
  0x73   : > { %1983 = vmatprep.mubr.msk.f32.mxu1 %vm195_vm0, %v2377_v7  ;;  %1987 = vmatpush3.msra.mxu0 %v2511_v17 }
  0x74   : > { %1984 = vmatmul.mubr.msk.f32.vlgmr.msra.gmra.mxu1 %vm195_vm0, %v2382_v8  ;;  %1988 = vmatprep.subr.mxu0 %v2488_v16 }
  0x75   : > { %1999 = vmatprep.subr.mxu1 %v2522_v18  ;;  %1989 = vmatpush3.msra.mxu0 %v2488_v16 }
  0x76   : > { %2000 = vmatpush3.msra.mxu1 %v2522_v18  ;;  %1990 = vmatprep.subr.mxu0 %v2477_v15 }
  0x77   : > { %2001 = vmatprep.subr.mxu1 %v2511_v17  ;;  %1991 = vmatpush3.msra.mxu0 %v2477_v15 }
  0x78   : > { %2002 = vmatpush3.msra.mxu1 %v2511_v17  ;;  %1992 = vmatprep.subr.mxu0 %v2454_v14 }
  0x79   : > { %2003 = vmatprep.subr.mxu1 %v2488_v16  ;;  %1993 = vmatpush3.msra.mxu0 %v2454_v14 }
  0x7a   : > { %2004 = vmatpush3.msra.mxu1 %v2488_v16  ;;  %1994 = vmatprep.subr.mxu0 %v2443_v13 }
  0x7b   : > { %2005 = vmatprep.subr.mxu1 %v2477_v15  ;;  %1995 = vmatpush3.msra.mxu0 %v2443_v13 }
  0x7c   : > { %1996 = vmatprep.mubr.msk.f32.mxu0 %vm195_vm0, %v2377_v7  ;;  %2006 = vmatpush3.msra.mxu1 %v2477_v15 }
  0x7d   : > { %1997 = vmatmul.mubr.msk.f32.vlgmr.msra.gmra.mxu0 %vm195_vm0, %v2382_v8  ;;  %2007 = vmatprep.subr.mxu1 %v2454_v14 }
  0x7e   : > { %2012 = vmatprep.subr.mxu0 %v2545_v19  ;;  %2008 = vmatpush3.msra.mxu1 %v2454_v14 }
  0x7f   : > { %2009 = vmatprep.mubr.msk.f32.mxu1 %vm195_vm0, %v2377_v7  ;;  %2013 = vmatpush3.msra.mxu0 %v2545_v19 }
  0x80   : > { %2010 = vmatmul.mubr.msk.f32.vlgmr.msra.gmra.mxu1 %vm195_vm0, %v2382_v8  ;;  %2014 = vmatprep.subr.mxu0 %v2522_v18 }
  0x81   : > { %2025 = vmatprep.subr.mxu1 %v2556_v20  ;;  %2015 = vmatpush3.msra.mxu0 %v2522_v18 }
  0x82   : > { %2026 = vmatpush3.msra.mxu1 %v2556_v20  ;;  %2016 = vmatprep.subr.mxu0 %v2511_v17 }
  0x83   : > { %2027 = vmatprep.subr.mxu1 %v2545_v19  ;;  %2017 = vmatpush3.msra.mxu0 %v2511_v17 }
  0x84   : > { %2028 = vmatpush3.msra.mxu1 %v2545_v19  ;;  %2018 = vmatprep.subr.mxu0 %v2488_v16 }
  0x85   : > { %2029 = vmatprep.subr.mxu1 %v2522_v18  ;;  %2019 = vmatpush3.msra.mxu0 %v2488_v16 }
  0x86   : > { %2030 = vmatpush3.msra.mxu1 %v2522_v18  ;;  %2020 = vmatprep.subr.mxu0 %v2477_v15 }
  0x87   : > { %2031 = vmatprep.subr.mxu1 %v2511_v17  ;;  %2021 = vmatpush3.msra.mxu0 %v2477_v15 }
  0x88   : > { %2022 = vmatprep.mubr.msk.f32.mxu0 %vm195_vm0, %v2377_v7  ;;  %2032 = vmatpush3.msra.mxu1 %v2511_v17 }
  0x89   : > { %2023 = vmatmul.mubr.msk.f32.vlgmr.msra.gmra.mxu0 %vm195_vm0, %v2382_v8  ;;  %2033 = vmatprep.subr.mxu1 %v2488_v16 }
  0x8a   : > { %2038 = vmatprep.subr.mxu0 %v1347_v21  ;;  %2034 = vmatpush3.msra.mxu1 %v2488_v16 }
  0x8b   : > { %2035 = vmatprep.mubr.msk.f32.mxu1 %vm195_vm0, %v2377_v7  ;;  %2039 = vmatpush3.msra.mxu0 %v1347_v21 }
  0x8c   : > { %2036 = vmatmul.mubr.msk.f32.vlgmr.msra.gmra.mxu1 %vm195_vm0, %v2382_v8  ;;  %2040 = vmatprep.subr.mxu0 %v2556_v20 }
  0x8d   : > { %2051 = vmatprep.subr.mxu1 %v1429_v22  ;;  %2041 = vmatpush3.msra.mxu0 %v2556_v20 }
  0x8e   : > { %2052 = vmatpush3.msra.mxu1 %v1429_v22  ;;  %2042 = vmatprep.subr.mxu0 %v2545_v19 }
  0x8f   : > { %2053 = vmatprep.subr.mxu1 %v1347_v21  ;;  %2043 = vmatpush3.msra.mxu0 %v2545_v19 }
  0x90   : > { %2054 = vmatpush3.msra.mxu1 %v1347_v21  ;;  %2044 = vmatprep.subr.mxu0 %v2522_v18 }
  0x91   : > { %2055 = vmatprep.subr.mxu1 %v2556_v20  ;;  %2045 = vmatpush3.msra.mxu0 %v2522_v18 }
  0x92   : > { %2056 = vmatpush3.msra.mxu1 %v2556_v20  ;;  %2046 = vmatprep.subr.mxu0 %v2511_v17 }
  0x93   : > { %2057 = vmatprep.subr.mxu1 %v2545_v19  ;;  %2047 = vmatpush3.msra.mxu0 %v2511_v17 }
  0x94   : > { %2048 = vmatprep.mubr.msk.f32.mxu0 %vm195_vm0, %v2377_v7  ;;  %2058 = vmatpush3.msra.mxu1 %v2545_v19 }
  0x95   : > { %2049 = vmatmul.mubr.msk.f32.vlgmr.msra.gmra.mxu0 %vm195_vm0, %v2382_v8  ;;  %2059 = vmatprep.subr.mxu1 %v2522_v18 }
  0x96   : > { %2064 = vmatprep.subr.mxu0 %v1511_v23  ;;  %2060 = vmatpush3.msra.mxu1 %v2522_v18 }
  0x97   : > { %2061 = vmatprep.mubr.msk.f32.mxu1 %vm195_vm0, %v2377_v7  ;;  %2065 = vmatpush3.msra.mxu0 %v1511_v23 }
  0x98   : > { %2062 = vmatmul.mubr.msk.f32.vlgmr.msra.gmra.mxu1 %vm195_vm0, %v2382_v8  ;;  %2066 = vmatprep.subr.mxu0 %v1429_v22 }
  0x99   : > { %2074 = vmatprep.mubr.msk.f32.mxu0 %vm195_vm0, %v2377_v7  ;;  %2067 = vmatpush3.msra.mxu0 %v1429_v22 }
  0x9a   : > { %1593 = vperm.xlu0 %2132, %v1589_v24   ;;  %2068 = vmatprep.subr.mxu0 %v1347_v21 }
  0x9b   : > { %2069 = vmatpush3.msra.mxu0 %v1347_v21 }
  0x9c   : > { %2070 = vmatprep.subr.mxu0 %v2556_v20 }
  0x9d   : > { %2071 = vmatpush3.msra.mxu0 %v2556_v20 }
  0x9e   : > { %1598 = vperm.xlu0 %2132, %v1590_v25   ;;  %2072 = vmatprep.subr.mxu0 %v2545_v19 }
  0x9f   : > { %2073 = vmatpush3.msra.mxu0 %v2545_v19 }
  0xa0   : > { %2075 = vmatmul.mubr.msk.f32.vlgmr.msra.gmra.mxu0 %vm195_vm0, %v2382_v8 }
 0x102   : > { %v1868_v26 = vpop.f32.mrf.mxu0 }
 0x103   : > { %v1881_v27 = vpop.f32.mrf.mxu1 }
 0x104   : > { %v268_v28 = vpop.f32.mrf.mxu0  ;;  %v358_v31 = vmax.f32 %v1868_v26, %v1881_v27 }
 0x105   : > { %v348_v30 = vpop.f32.mrf.mxu1 }
 0x106   : > { %v357_v34 = vmax.f32 %v268_v28, %v348_v30 }
 0x10d   : > { %v1894_v29 = vpop.f32.mrf.mxu0 }
 0x10e   : > { %v440_v35 = vmax.f32 %v358_v31, %v1894_v29 }
 0x10f   : > { %v430_v32 = vpop.f32.mrf.mxu0 }
 0x110   : > { %v1907_v33 = vpop.f32.mrf.mxu1  ;;  %v439_v37 = vmax.f32 %v357_v34, %v430_v32 }
 0x111   : > { %v522_v39 = vmax.f32 %v440_v35, %v1907_v33 }
 0x112   : > { %v512_v38 = vpop.f32.mrf.mxu1 }
 0x113   : > { %v521_v42 = vmax.f32 %v439_v37, %v512_v38 }
 0x115   : > { %v1594_v20 = vpop.permute.xlu0 %1593 }
 0x119   : > { %v1920_v36 = vpop.f32.mrf.mxu0  ;;  %v1599_v27 = vpop.permute.xlu0 %1598 }
 0x11a   : > { %v604_v43 = vmax.f32 %v522_v39, %v1920_v36 }
 0x11b   : > { %v594_v40 = vpop.f32.mrf.mxu0 }
 0x11c   : > { %v1933_v41 = vpop.f32.mrf.mxu1  ;;  %v603_v45 = vmax.f32 %v521_v42, %v594_v40 }
 0x11d   : > { %v686_v47 = vmax.f32 %v604_v43, %v1933_v41 }
 0x11e   : > { %v676_v46 = vpop.f32.mrf.mxu1 }
 0x11f   : > { %v685_v50 = vmax.f32 %v603_v45, %v676_v46 }
 0x125   : > { %v1946_v44 = vpop.f32.mrf.mxu0 }
 0x126   : > { %v768_v51 = vmax.f32 %v686_v47, %v1946_v44 }
 0x127   : > { %v758_v48 = vpop.f32.mrf.mxu0 }
 0x128   : > { %v1959_v49 = vpop.f32.mrf.mxu1  ;;  %v767_v53 = vmax.f32 %v685_v50, %v758_v48 }
 0x129   : > { %v850_v55 = vmax.f32 %v768_v51, %v1959_v49 }
 0x12a   : > { %v840_v54 = vpop.f32.mrf.mxu1 }
 0x12b   : > { %v849_v58 = vmax.f32 %v767_v53, %v840_v54 }
 0x131   : > { %v1972_v52 = vpop.f32.mrf.mxu0 }
 0x132   : > { %v932_v59 = vmax.f32 %v850_v55, %v1972_v52 }
 0x133   : > { %v922_v56 = vpop.f32.mrf.mxu0 }
 0x134   : > { %v1985_v57 = vpop.f32.mrf.mxu1  ;;  %v931_v61 = vmax.f32 %v849_v58, %v922_v56 }
 0x135   : > { %v1014_v63 = vmax.f32 %v932_v59, %v1985_v57 }
 0x136   : > { %v1004_v62 = vpop.f32.mrf.mxu1 }
 0x137   : > { %v1013_v2 = vmax.f32 %v931_v61, %v1004_v62 }
 0x13d   : > { %v1998_v60 = vpop.f32.mrf.mxu0 }
 0x13e   : > { %v1096_v3 = vmax.f32 %v1014_v63, %v1998_v60 }
 0x13f   : > { %v1086_v0 = vpop.f32.mrf.mxu0 }
 0x140   : > { %v2011_v1 = vpop.f32.mrf.mxu1  ;;  %v1095_v5 = vmax.f32 %v1013_v2, %v1086_v0 }
 0x141   : > { %v1178_v7 = vmax.f32 %v1096_v3, %v2011_v1 }
 0x142   : > { %v1168_v6 = vpop.f32.mrf.mxu1 }
 0x143   : > { %v1177_v10 = vmax.f32 %v1095_v5, %v1168_v6 }
 0x149   : > { %v2024_v4 = vpop.f32.mrf.mxu0 }
 0x14a   : > { %v1260_v11 = vmax.f32 %v1178_v7, %v2024_v4 }
 0x14b   : > { %v1250_v8 = vpop.f32.mrf.mxu0 }
 0x14c   : > { %v2037_v9 = vpop.f32.mrf.mxu1  ;;  %v1259_v13 = vmax.f32 %v1177_v10, %v1250_v8 }
 0x14d   : > { %v1342_v15 = vmax.f32 %v1260_v11, %v2037_v9 }
 0x14e   : > { %v1332_v14 = vpop.f32.mrf.mxu1 }
 0x14f   : > { %v1341_v18 = vmax.f32 %v1259_v13, %v1332_v14 }
 0x155   : > { %v2050_v12 = vpop.f32.mrf.mxu0 }
 0x156   : > { %v1424_v19 = vmax.f32 %v1342_v15, %v2050_v12 }
 0x157   : > { %v1414_v16 = vpop.f32.mrf.mxu0 }
 0x158   : > { %v2063_v17 = vpop.f32.mrf.mxu1  ;;  %v1423_v21 = vmax.f32 %v1341_v18, %v1414_v16 }
 0x159   : > { %v1506_v23 = vmax.f32 %v1424_v19, %v2063_v17 }
 0x15a   : > { %v1496_v22 = vpop.f32.mrf.mxu1 }
 0x15b   : > { %v1505_v25 = vmax.f32 %v1423_v21, %v1496_v22 }
 0x160   : > { %v2076_v24 = vpop.f32.mrf.mxu0 }
 0x161   : > { %v1588_v26 = vmax.f32 %v1506_v23, %v2076_v24 }
 0x162   : > { %v1578_v28 = vpop.f32.mrf.mxu0 }
 0x163   : > { %v1602_v29 = vadd.f32 %v1599_v27, %v1588_v26  ;;  %v1587_v30 = vmax.f32 %v1505_v25, %v1578_v28 }
 0x165   : > { %v1604_v31 = vmax.f32 %v1602_v29, 0.0  ;;  %v1601_v32 = vadd.f32 %v1594_v20, %v1587_v30 }
 0x167   : > { %1606 = vst [vmem:[%s187_s26 + $0x8] sm:$0xff] %v1604_v31  ;;  %v1603_v33 = vmax.f32 %v1601_v32, 0.0 }
 0x169   : > { %1605 = vst [vmem:[%s187_s26] sm:$0xff] %v1603_v33 }
 0x16a   : > { %2174 = shalt.err (!%p2171_p9)
}
 0x16b   : > { %s2175_s4 = scalar_lea.hbm %s2636_s9, 256  ;;  %s2179_s17 = scalar_lea.hbm %s2681_s3, 1024 }
 0x16c   : > { %p2176_p0 = scmp.ne.s32.totalorder %s2636_s9, %s2175_s4  ;;  %p2180_p1 = scmp.lt.s32.totalorder %s2636_s9, %s2681_s3 }
 0x16d   : > { %p2181_p3 = scmp.lt.s32.totalorder %s2179_s17, %s2175_s4 }
 0x16e   : > { %p2177_p2 = pnand %p2176_p0, %p2690_p11 }
 0x16f   : > { %p2182_p6 = por %p2181_p3, %p2180_p1 }
 0x170   : > { %p2178_p13 = pneg %p2177_p2 }
 0x172   : > { %p2183_p10 = pnand %p2182_p6, %p2178_p13 }
 0x174   : > { %2186 = shalt.err (!%p2183_p10)
}
 0x175   : > { %s2233_s25 = smov 128   ;;  %s2234_s26 = smov 512  }
 0x176   : > { %s2235_s28 = smov 8  }
 0x177   : > { %2081 = dma.vmem_to_hbm [thread:$0]  (%p2690_p11), %s2631_s27, 256, %s2636_s9, %s1608_s10, %s2233_s25, %s2234_s26, %s2235_s28  }
 0x178 PF: > { %p2092_p12 = scmp.ge.s32.totalorder %s2225_s15, 2  ;;  %s1635_s29 = sand.u32 1, %s2213_s12  }
 0x179   : > { %p2691_p4 = scmp.ne.s32.totalorder %s2686_s24, 0  ;;  %s1636_s5 = scalar_lea.sflag [#allocation4], %s1635_s29 }
 0x17b   : > { %p2088_p5 = pnand %p2092_p12, %p2691_p4 }
 0x17d   : > { %p2089_p7 = pneg %p2088_p5 }
 0x17f   : > { %2208 = dma.done.wait (%p2089_p7), %s1636_s5, 256  }
 0x180   : > { %2210 = vsyncadd (%p2089_p7), %s1636_s5, 4294967040  ;;  %p16_p8 = scmp.ge.s32.totalorder %s2281_s18, 6   ;;  %s2692_s12 = smov %s2217_s13 }
 0x181   : > { %s2693_s13 = smov %s2221_s14  ;;  %s2694_s14 = smov %s2293_s21 }
 0x182   : > { %s2695_s15 = smov %s2281_s18  ;;  %18 = sbr.rel (!%p16_p8) target bundleno = 5 (0x5), region = 77 }
 0x187   :  { %1641 = vsyncpa [#allocation3], 1 }
 0x188   :  { %1643 = vsyncpa [#allocation3 + $0x1], 1 }
 0x189   :  { %1644 = vsyncpa [#allocation4], 1 }
 0x18a   :  { %1646 = vsyncpa [#allocation4 + $0x1], 1 }

</bundles_post_ra>
